<compile_context>
chip_gen: v7x
topology: tpu7x:2x2x1
jax: 0.10.0
libtpu: 0.0.40
codegen_flags: <defaults>
</compile_context>

<pallas_src>
import functools

import jax
import jax.numpy as jnp
from jax.experimental import pallas as pl
from jax.experimental.pallas import tpu as pltpu


def _rnn_classifier_kernel(x_ref, wx_t_ref, b_ref, wh_t_ref, wf_t_ref, bf_ref,
                           out_ref, xproj_ref, *, seq_len, batch, unrolled):
    """Full recurrence + classifier head, resident in VMEM.

    x_ref:     (S*Bp, I)  bf16  flattened, batch-padded input sequence
    wx_t_ref:  (I, H)     bf16  linear_x weight, pre-transposed
    b_ref:     (1, H)     f32   fused bias (bx + bh)
    wh_t_ref:  (H, H)     bf16  linear_h weight, pre-transposed
    wf_t_ref:  (H, Cp)    bf16  fc weight, pre-transposed, lane-padded
    bf_ref:    (1, Cp)    f32   fc bias, lane-padded with zeros
    out_ref:   (Bp, Cp)   f32   lane-dense logits (sliced to (B, C) outside)
    xproj_ref: (S*Bp, H)  f32   scratch for the hoisted projection (large-S path)
    """
    H = wh_t_ref.shape[0]

    # (1) Hoisted input projection: ONE MXU call for every timestep, with the
    #     fused recurrent bias added once -- all off the serial h-chain.
    xproj = (
        jnp.dot(x_ref[...], wx_t_ref[...], preferred_element_type=jnp.float32)
        + b_ref[...]
    )                                                       # (S*Bp, H) f32

    # Recurrent weight stays resident (bf16) across all steps.
    wh_t = wh_t_ref[...]

    # bf16-carried hidden state: no per-step cast on the MXU operand side.
    h = jnp.zeros((batch, H), jnp.bfloat16)

    if unrolled:
        # (2a) Small S: xproj stays vreg-resident, recurrence fully unrolled so
        #      the scheduler can overlap step i's tanh (EUP) with step i+1's
        #      MXU push.  Per step: (Bp,H)@(H,H) bf16 matmul + f32 add + tanh.
        for i in range(seq_len):
            pre = xproj[i * batch:(i + 1) * batch] + jnp.dot(
                h, wh_t, preferred_element_type=jnp.float32)
            h = jnp.tanh(pre).astype(jnp.bfloat16)          # RNN default = tanh
    else:
        # (2b) Large S (scaling guard): park xproj in VMEM scratch and reload
        #      an aligned (Bp,H) slice per step (the vld dual-issues off the
        #      serial chain); partially-unrolled fori_loop bounds vreg live
        #      ranges so the kernel never goes spill-bound as S*Bp grows.
        xproj_ref[...] = xproj

        def step(i, h_carry):
            off = pl.multiple_of(i * batch, 8)
            pre = xproj_ref[pl.ds(off, batch), :] + jnp.dot(
                h_carry, wh_t, preferred_element_type=jnp.float32)
            return jnp.tanh(pre).astype(jnp.bfloat16)

        h = jax.lax.fori_loop(0, seq_len, step, h, unroll=4)

    # (3) Classifier head on the final hidden state; lane-padded (Bp, Cp)
    #     output -> unmasked, lane-dense store.
    out_ref[...] = (
        jnp.dot(h, wf_t_ref[...], preferred_element_type=jnp.float32)
        + bf_ref[...]
    )


def pack_rnn_classifier_params(wx, bx, wh, bh, wf, bf):
    """One-time weight packing (PyTorch layout in, kernel layout out).

    wx: (H, I), bx: (H,), wh: (H, H), bh: (H,), wf: (C, H), bf: (C,)
    Call ONCE at model-load time, NOT per forward call (perf review item:
    per-call transposes / pads / bias fusion rivalled the kernel runtime).
    """
    H, _ = wx.shape
    C = wf.shape[0]
    Cp = max(128, ((C + 127) // 128) * 128)      # lane-pad classes to 128

    wx_t = jnp.asarray(wx).T.astype(jnp.bfloat16)                     # (I, H)
    wh_t = jnp.asarray(wh).T.astype(jnp.bfloat16)                     # (H, H)
    b = (jnp.asarray(bx) + jnp.asarray(bh)).astype(jnp.float32).reshape(1, H)
    wf_t = (jnp.zeros((H, Cp), jnp.bfloat16)
            .at[:, :C].set(jnp.asarray(wf).T.astype(jnp.bfloat16)))   # (H, Cp)
    bf_p = (jnp.zeros((1, Cp), jnp.float32)
            .at[:, :C].set(jnp.asarray(bf).astype(jnp.float32)))      # (1, Cp)

    return {"wx_t": wx_t, "b": b, "wh_t": wh_t, "wf_t": wf_t,
            "bf_p": bf_p, "classes": C}


@functools.partial(jax.jit, static_argnames=("classes",))
def _forward_packed(x, wx_t, b, wh_t, wf_t, bf_p, *, classes):
    """x: (S, B, I) float32; weights already packed by pack_rnn_classifier_params."""
    S, B, _ = x.shape
    H = wh_t.shape[0]
    Cp = wf_t.shape[1]
    Bp = max(8, ((B + 7) // 8) * 8)              # sublane-pad batch to 8

    # Per-call activation prep only: pad batch with zero rows (sliced off after
    # the call), flatten (S, Bp) so the hoisted projection is one matmul and
    # every per-step slice is sublane-aligned, cast to the native MXU dtype.
    x_flat = (jnp.pad(x, ((0, 0), (0, Bp - B), (0, 0)))
              .reshape(S * Bp, -1).astype(jnp.bfloat16))

    unrolled = S <= 16                           # scaling guard (review item)

    out_p = pl.pallas_call(
        functools.partial(_rnn_classifier_kernel,
                          seq_len=S, batch=Bp, unrolled=unrolled),
        out_shape=jax.ShapeDtypeStruct((Bp, Cp), jnp.float32),
        in_specs=[
            pl.BlockSpec(memory_space=pltpu.VMEM),  # x_flat
            pl.BlockSpec(memory_space=pltpu.VMEM),  # wx_t
            pl.BlockSpec(memory_space=pltpu.VMEM),  # fused bias
            pl.BlockSpec(memory_space=pltpu.VMEM),  # wh_t
            pl.BlockSpec(memory_space=pltpu.VMEM),  # wf_t (lane-padded)
            pl.BlockSpec(memory_space=pltpu.VMEM),  # bf   (lane-padded)
        ],
        out_specs=pl.BlockSpec(memory_space=pltpu.VMEM),
        scratch_shapes=[pltpu.VMEM((S * Bp, H), jnp.float32)],  # xproj (large-S path)
    )(x_flat, wx_t, b, wh_t, wf_t, bf_p)

    # Slice off the batch padding rows and the zero-padded class lanes.
    return out_p[:B, :classes]


def rnn_classifier_forward(x, packed):
    return _forward_packed(x, packed["wx_t"], packed["b"], packed["wh_t"],
                           packed["wf_t"], packed["bf_p"],
                           classes=packed["classes"])


def _reference(x, wx, bx, wh, bh, wf, bf):
    """Pure-JAX f32 reference mirroring the PyTorch forward."""
    S, B, _ = x.shape
    H = wx.shape[0]
    h = jnp.zeros((B, H), jnp.float32)
    for i in range(S):
        h = jnp.tanh(x[i] @ wx.T + bx + h @ wh.T + bh)
    return h @ wf.T + bf


if __name__ == "__main__":
    # Shapes implied by the module: input_size=28 (MNIST row), hidden=128,
    # classes=10; small seq/batch for the demo.
    seq_len, batch, input_size, hidden, classes = 8, 4, 28, 128, 10

    key = jax.random.PRNGKey(0)
    k = jax.random.split(key, 8)

    # Deterministic synthetic parameters (PyTorch-Linear-like uniform init).
    def uinit(kk, shape, fan_in):
        bound = 1.0 / jnp.sqrt(fan_in)
        return jax.random.uniform(kk, shape, jnp.float32, -bound, bound)

    x = jax.random.normal(k[0], (seq_len, batch, input_size), jnp.float32)
    wx = uinit(k[1], (hidden, input_size), input_size)
    bx = uinit(k[2], (hidden,), input_size)
    wh = uinit(k[3], (hidden, hidden), hidden)
    bh = uinit(k[4], (hidden,), hidden)
    wf = uinit(k[5], (classes, hidden), hidden)
    bf = uinit(k[6], (classes,), hidden)

    # Weight packing happens ONCE, outside the hot path (perf review item).
    packed = pack_rnn_classifier_params(wx, bx, wh, bh, wf, bf)

    out = rnn_classifier_forward(x, packed)
    out = jax.block_until_ready(out)

    ref = _reference(x, wx, bx, wh, bh, wf, bf)
    assert out.shape == (batch, classes)
    # bf16 MXU operands with f32 accumulation: same rounding points as the
    # previously validated version; tolerance unchanged.
    assert jnp.allclose(out, ref, atol=2e-2, rtol=2e-2), "mismatch vs reference"

    print("KERNEL_OK")
</pallas_src>

<mosaic_0001>
module attributes {stable_mosaic.version = 11 : i64} {
  func.func @_rnn_classifier_kernel(%arg0: memref<64x28xbf16, #tpu.memory_space<vmem>>, %arg1: memref<28x128xbf16, #tpu.memory_space<vmem>>, %arg2: memref<1x128xf32, #tpu.memory_space<vmem>>, %arg3: memref<128x128xbf16, #tpu.memory_space<vmem>>, %arg4: memref<128x128xbf16, #tpu.memory_space<vmem>>, %arg5: memref<1x128xf32, #tpu.memory_space<vmem>>, %arg6: memref<8x128xf32, #tpu.memory_space<vmem>>, %arg7: memref<64x128xf32, #tpu.memory_space<vmem>>) attributes {dimension_semantics = [], scalar_prefetch = 0 : i64, scratch_operands = 1 : i64, tpu.core_type = #tpu.core_type<tc>} {
    %c0 = arith.constant 0 : index
    %c0_0 = arith.constant 0 : index
    %0 = vector.load %arg0[%c0, %c0_0] : memref<64x28xbf16, #tpu.memory_space<vmem>>, vector<64x28xbf16>
    %c0_1 = arith.constant 0 : index
    %c0_2 = arith.constant 0 : index
    %1 = vector.load %arg1[%c0_1, %c0_2] : memref<28x128xbf16, #tpu.memory_space<vmem>>, vector<28x128xbf16>
    %cst = arith.constant dense<0.000000e+00> : vector<64x128xf32>
    %2 = tpu.matmul %0, %1, %cst {dimension_numbers = #tpu.dot_dimension_numbers<[1], [0], [0], [1], [0, 0, 1, 1], [], []>} : vector<64x28xbf16>, vector<28x128xbf16>, vector<64x128xf32> -> vector<64x128xf32>
    %c0_3 = arith.constant 0 : index
    %c0_4 = arith.constant 0 : index
    %3 = vector.load %arg2[%c0_3, %c0_4] : memref<1x128xf32, #tpu.memory_space<vmem>>, vector<1x128xf32>
    %4 = vector.broadcast %3 : vector<1x128xf32> to vector<64x128xf32>
    %5 = arith.addf %2, %4 : vector<64x128xf32>
    %c0_5 = arith.constant 0 : index
    %c0_6 = arith.constant 0 : index
    %6 = vector.load %arg3[%c0_5, %c0_6] : memref<128x128xbf16, #tpu.memory_space<vmem>>, vector<128x128xbf16>
    %cst_7 = arith.constant 0.000000e+00 : bf16
    %7 = vector.broadcast %cst_7 : bf16 to vector<8x128xbf16>
    %8 = vector.extract_strided_slice %5 {offsets = [0, 0], sizes = [8, 128], strides = [1, 1]} : vector<64x128xf32> to vector<8x128xf32>
    %cst_8 = arith.constant dense<0.000000e+00> : vector<8x128xf32>
    %9 = tpu.matmul %7, %6, %cst_8 {dimension_numbers = #tpu.dot_dimension_numbers<[1], [0], [0], [1], [0, 0, 1, 1], [], []>} : vector<8x128xbf16>, vector<128x128xbf16>, vector<8x128xf32> -> vector<8x128xf32>
    %10 = arith.addf %8, %9 : vector<8x128xf32>
    %11 = math.tanh %10 : vector<8x128xf32>
    %12 = arith.truncf %11 : vector<8x128xf32> to vector<8x128xbf16>
    %13 = vector.extract_strided_slice %5 {offsets = [8, 0], sizes = [8, 128], strides = [1, 1]} : vector<64x128xf32> to vector<8x128xf32>
    %cst_9 = arith.constant dense<0.000000e+00> : vector<8x128xf32>
    %14 = tpu.matmul %12, %6, %cst_9 {dimension_numbers = #tpu.dot_dimension_numbers<[1], [0], [0], [1], [0, 0, 1, 1], [], []>} : vector<8x128xbf16>, vector<128x128xbf16>, vector<8x128xf32> -> vector<8x128xf32>
    %15 = arith.addf %13, %14 : vector<8x128xf32>
    %16 = math.tanh %15 : vector<8x128xf32>
    %17 = arith.truncf %16 : vector<8x128xf32> to vector<8x128xbf16>
    %18 = vector.extract_strided_slice %5 {offsets = [16, 0], sizes = [8, 128], strides = [1, 1]} : vector<64x128xf32> to vector<8x128xf32>
    %cst_10 = arith.constant dense<0.000000e+00> : vector<8x128xf32>
    %19 = tpu.matmul %17, %6, %cst_10 {dimension_numbers = #tpu.dot_dimension_numbers<[1], [0], [0], [1], [0, 0, 1, 1], [], []>} : vector<8x128xbf16>, vector<128x128xbf16>, vector<8x128xf32> -> vector<8x128xf32>
    %20 = arith.addf %18, %19 : vector<8x128xf32>
    %21 = math.tanh %20 : vector<8x128xf32>
    %22 = arith.truncf %21 : vector<8x128xf32> to vector<8x128xbf16>
    %23 = vector.extract_strided_slice %5 {offsets = [24, 0], sizes = [8, 128], strides = [1, 1]} : vector<64x128xf32> to vector<8x128xf32>
    %cst_11 = arith.constant dense<0.000000e+00> : vector<8x128xf32>
    %24 = tpu.matmul %22, %6, %cst_11 {dimension_numbers = #tpu.dot_dimension_numbers<[1], [0], [0], [1], [0, 0, 1, 1], [], []>} : vector<8x128xbf16>, vector<128x128xbf16>, vector<8x128xf32> -> vector<8x128xf32>
    %25 = arith.addf %23, %24 : vector<8x128xf32>
    %26 = math.tanh %25 : vector<8x128xf32>
    %27 = arith.truncf %26 : vector<8x128xf32> to vector<8x128xbf16>
    %28 = vector.extract_strided_slice %5 {offsets = [32, 0], sizes = [8, 128], strides = [1, 1]} : vector<64x128xf32> to vector<8x128xf32>
    %cst_12 = arith.constant dense<0.000000e+00> : vector<8x128xf32>
    %29 = tpu.matmul %27, %6, %cst_12 {dimension_numbers = #tpu.dot_dimension_numbers<[1], [0], [0], [1], [0, 0, 1, 1], [], []>} : vector<8x128xbf16>, vector<128x128xbf16>, vector<8x128xf32> -> vector<8x128xf32>
    %30 = arith.addf %28, %29 : vector<8x128xf32>
    %31 = math.tanh %30 : vector<8x128xf32>
    %32 = arith.truncf %31 : vector<8x128xf32> to vector<8x128xbf16>
    %33 = vector.extract_strided_slice %5 {offsets = [40, 0], sizes = [8, 128], strides = [1, 1]} : vector<64x128xf32> to vector<8x128xf32>
    %cst_13 = arith.constant dense<0.000000e+00> : vector<8x128xf32>
    %34 = tpu.matmul %32, %6, %cst_13 {dimension_numbers = #tpu.dot_dimension_numbers<[1], [0], [0], [1], [0, 0, 1, 1], [], []>} : vector<8x128xbf16>, vector<128x128xbf16>, vector<8x128xf32> -> vector<8x128xf32>
    %35 = arith.addf %33, %34 : vector<8x128xf32>
    %36 = math.tanh %35 : vector<8x128xf32>
    %37 = arith.truncf %36 : vector<8x128xf32> to vector<8x128xbf16>
    %38 = vector.extract_strided_slice %5 {offsets = [48, 0], sizes = [8, 128], strides = [1, 1]} : vector<64x128xf32> to vector<8x128xf32>
    %cst_14 = arith.constant dense<0.000000e+00> : vector<8x128xf32>
    %39 = tpu.matmul %37, %6, %cst_14 {dimension_numbers = #tpu.dot_dimension_numbers<[1], [0], [0], [1], [0, 0, 1, 1], [], []>} : vector<8x128xbf16>, vector<128x128xbf16>, vector<8x128xf32> -> vector<8x128xf32>
    %40 = arith.addf %38, %39 : vector<8x128xf32>
    %41 = math.tanh %40 : vector<8x128xf32>
    %42 = arith.truncf %41 : vector<8x128xf32> to vector<8x128xbf16>
    %43 = vector.extract_strided_slice %5 {offsets = [56, 0], sizes = [8, 128], strides = [1, 1]} : vector<64x128xf32> to vector<8x128xf32>
    %cst_15 = arith.constant dense<0.000000e+00> : vector<8x128xf32>
    %44 = tpu.matmul %42, %6, %cst_15 {dimension_numbers = #tpu.dot_dimension_numbers<[1], [0], [0], [1], [0, 0, 1, 1], [], []>} : vector<8x128xbf16>, vector<128x128xbf16>, vector<8x128xf32> -> vector<8x128xf32>
    %45 = arith.addf %43, %44 : vector<8x128xf32>
    %46 = math.tanh %45 : vector<8x128xf32>
    %47 = arith.truncf %46 : vector<8x128xf32> to vector<8x128xbf16>
    %c0_16 = arith.constant 0 : index
    %c0_17 = arith.constant 0 : index
    %48 = vector.load %arg4[%c0_16, %c0_17] : memref<128x128xbf16, #tpu.memory_space<vmem>>, vector<128x128xbf16>
    %cst_18 = arith.constant dense<0.000000e+00> : vector<8x128xf32>
    %49 = tpu.matmul %47, %48, %cst_18 {dimension_numbers = #tpu.dot_dimension_numbers<[1], [0], [0], [1], [0, 0, 1, 1], [], []>} : vector<8x128xbf16>, vector<128x128xbf16>, vector<8x128xf32> -> vector<8x128xf32>
    %c0_19 = arith.constant 0 : index
    %c0_20 = arith.constant 0 : index
    %50 = vector.load %arg5[%c0_19, %c0_20] : memref<1x128xf32, #tpu.memory_space<vmem>>, vector<1x128xf32>
    %51 = vector.broadcast %50 : vector<1x128xf32> to vector<8x128xf32>
    %52 = arith.addf %49, %51 : vector<8x128xf32>
    %c0_21 = arith.constant 0 : index
    %c0_22 = arith.constant 0 : index
    %53 = vector.load %arg6[%c0_21, %c0_22] : memref<8x128xf32, #tpu.memory_space<vmem>>, vector<8x128xf32>
    tpu.vector_store %arg6[%c0_21, %c0_22], %52 {strides = array<i32>} : memref<8x128xf32, #tpu.memory_space<vmem>>, vector<8x128xf32>,
    return
  }
}

</mosaic_0001>

<bundles_post_ra>
// kernel: _forward_packed.1
= control target key start
LH: loop header
LB: loop body
LE: loop exit
PB: predicated region body
PF: predicated region fallthrough
CT: control target
= control target key end

     0   :  { %11 = vsyncpa [#allocation4], 0  ;;  %s1071_s21 = smov [#allocation3]   ;;  %s1377_s0 = inlined_call_operand.vmem [shape: bf16[64,28], index: 0, kind: input, shape index: {}]   ;;  %s1378_s1 = inlined_call_operand.vmem [shape: bf16[28,128], index: 1, kind: input, shape index: {}]   ;;  %s1379_s2 = inlined_call_operand.vmem [shape: f32[1,128], index: 2, kind: input, shape index: {}]   ;;  %s1380_s3 = inlined_call_operand.vmem [shape: bf16[128,128], index: 3, kind: input, shape index: {}]   ;;  %s1381_s4 = inlined_call_operand.hbm [shape: bf16[128,128], index: 4, kind: input, shape index: {}]   ;;  %s1382_s5 = inlined_call_operand.vmem [shape: f32[1,128], index: 5, kind: input, shape index: {}]   ;;  %s1383_s6 = inlined_call_operand.vmem [shape: f32[8,128], index: 6, kind: output, shape index: {}]  }
   0x1   :  { %s25_s22 = sshll.u32 %s1071_s21, 4  ;;  %s1047_s25 = scalar_lea.hbm %s1381_s4, 1024  ;;  %s26_s22 = int_to_ptr.vmem [resolvable:$true] %s25_s22 }
   0x2   :  { %p1048_p0 = scmp.ne.s32.totalorder %s1381_s4, %s1047_s25  ;;  %p1051_p1 = scmp.lt.u32.totalorder %s1047_s25, %s1381_s4 }
   0x4   :  { %p1053_p2 = pnand %p1051_p1, %p1048_p0 }
   0x6   :  { %1056 = shalt.err (!%p1053_p2)
}
   0x7   :  { %s1057_s30 = scalar_lea.vmem %s26_s22, 1024  ;;  %p1062_p4 = scmp.lt.s32.totalorder %s26_s22, %s26_s22 }
   0x8   :  { %p1058_p3 = scmp.ne.s32.totalorder %s26_s22, %s1057_s30  ;;  %p1063_p5 = scmp.lt.s32.totalorder %s1057_s30, %s1057_s30 }
   0xa   :  { %p1064_p6 = por %p1063_p5, %p1062_p4 }
   0xc   :  { %p1065_p7 = pnand %p1064_p6, %p1058_p3 }
   0xe   :  { %1068 = shalt.err (!%p1065_p7)
}
   0xf   :  { %s1072_s7 = smov 64   ;;  %s1073_s8 = smov 4  }
  0x10   :  { %31 = dma.hbm_to_vmem [thread:$0]  %s1381_s4, 1024, %s26_s22, [#allocation4], %s1072_s7, %s1072_s7, %s1073_s8  }
  0x11   :  { %1069 = dma.done.wait [#allocation4], 1024  }
  0x12   :  { %1070 = vsyncadd [#allocation4], 4294966272  ;;  %v1074_v0 = vmov 0.0   ;;  %vm1075_vm0 = vmmov 0   ;;  %v1130_v1 = vld [vmem:[%s1380_s3] sm:$0xff]   ;;  %v1136_v2 = vld [vmem:[%s1380_s3 + $0x8] sm:$0xff]  }
  0x13   :  { %822 = vmatprep.subr.bf16.mxu1 %v1074_v0  ;;  %838 = vmatprep.mubr.msk.bf16.mxu1 %vm1075_vm0, %v1074_v0  ;;  %v1014_v3 = vld [vmem:[%s1378_s1] sm:$0xff]   ;;  %vm101_vm1 = vcmask 1045504   ;;  %v1146_v4 = vld [vmem:[%s1380_s3 + $0x10] sm:$0xff]   ;;  %vm88_vm2 = vcmask 228352   ;;  %v1016_v5 = vld [vmem:[%s1378_s1 + $0x8] sm:$0x3f]  }
  0x14   :  { %823 = vmatpush3.bf16.msra.mxu1 %v1130_v1  ;;  %810 = vmatprep.subr.bf16.mxu0 %v1014_v3  ;;  %v1017_v6 = vld [vmem:[%s1377_s0] sm:$0xff]   ;;  %v103_v7 = vsel %vm101_vm1, %v1016_v5, 0  ;;  %v1159_v8 = vld [vmem:[%s1380_s3 + $0x18] sm:$0xff]   ;;  %v1019_v9 = vld [vmem:[%s1377_s0 + $0x8] sm:$0xff]   ;;  %v1076_v14 = vmov 0  }
  0x15   :  { %824 = vmatprep.subr.bf16.mxu1 %v1074_v0  ;;  %811 = vmatpush3.bf16.msra.mxu0 %v1014_v3  ;;  %v1169_v10 = vld [vmem:[%s1380_s3 + $0x20] sm:$0xff]   ;;  %v1181_v11 = vld [vmem:[%s1380_s3 + $0x28] sm:$0xff]   ;;  %v1190_v12 = vld [vmem:[%s1380_s3 + $0x30] sm:$0xff]  }
  0x16   :  { %1002 = vmatprep.subr.msk.bf16.mxu0 %vm101_vm1, %v1016_v5  ;;  %814 = vmatprep.mubr.msk.bf16.mxu0 %vm88_vm2, %v1017_v6  ;;  %v1199_v13 = vld [vmem:[%s1380_s3 + $0x38] sm:$0xff]   ;;  %v1021_v15 = vld [vmem:[%s1377_s0 + $0x10] sm:$0xff]   ;;  %v1249_v21 = vld [vmem:[%s1379_s2] ss:$0 sm:$0xff] }
  0x17   :  { %v1022_v16 = vld [vmem:[%s1377_s0 + $0x18] sm:$0xff]  }
  0x18   :  { %825 = vmatpush3.bf16.msra.mxu1 %v1136_v2 }
  0x19   :  { %826 = vmatprep.subr.bf16.mxu1 %v1074_v0  ;;  %813 = vmatpush3.bf16.msra.mxu0 %v103_v7 }
  0x1a   :  { %842 = vmatprep.subr.bf16.mxu0 %v1074_v0 }
  0x1c   :  { %827 = vmatpush3.bf16.msra.mxu1 %v1146_v4  ;;  %815 = vmatmul.mubr.msk.bf16.vlgmr.msra.gmra.mrb[0].mxu0 %vm88_vm2, %v1019_v9 }
  0x1d   :  { %828 = vmatprep.subr.bf16.mxu1 %v1074_v0  ;;  %843 = vmatpush3.bf16.msra.mxu0 %v1130_v1 }
  0x1e   :  { %844 = vmatprep.subr.bf16.mxu0 %v1074_v0  ;;  %818 = vmatprep.mubr.msk.bf16.mxu0 %vm88_vm2, %v1021_v15 }
  0x20   :  { %829 = vmatpush3.bf16.msra.mxu1 %v1159_v8 }
  0x21   :  { %830 = vmatprep.subr.bf16.mxu1 %v1074_v0  ;;  %845 = vmatpush3.bf16.msra.mxu0 %v1136_v2 }
  0x22   :  { %846 = vmatprep.subr.bf16.mxu0 %v1074_v0 }
  0x24   :  { %831 = vmatpush3.bf16.msra.mxu1 %v1169_v10  ;;  %819 = vmatmul.mubr.msk.bf16.gmra.mrb[4].mxu0 %vm88_vm2, %v1022_v16 }
  0x25   :  { %832 = vmatprep.subr.bf16.mxu1 %v1074_v0  ;;  %847 = vmatpush3.bf16.msra.mxu0 %v1146_v4 }
  0x26   :  { %848 = vmatprep.subr.bf16.mxu0 %v1074_v0  ;;  %858 = vmatprep.mubr.msk.bf16.mxu0 %vm1075_vm0, %v1074_v0 }
  0x28   :  { %833 = vmatpush3.bf16.msra.mxu1 %v1181_v11 }
  0x29   :  { %834 = vmatprep.subr.bf16.mxu1 %v1074_v0  ;;  %849 = vmatpush3.bf16.msra.mxu0 %v1159_v8 }
  0x2a   :  { %850 = vmatprep.subr.bf16.mxu0 %v1074_v0 }
  0x2c   :  { %835 = vmatpush3.bf16.msra.mxu1 %v1190_v12 }
  0x2d   :  { %836 = vmatprep.subr.bf16.mxu1 %v1074_v0  ;;  %851 = vmatpush3.bf16.msra.mxu0 %v1169_v10 }
  0x2e   :  { %852 = vmatprep.subr.bf16.mxu0 %v1074_v0 }
  0x30   :  { %837 = vmatpush3.bf16.msra.mxu1 %v1199_v13 }
  0x31   :  { %862 = vmatprep.subr.bf16.mxu1 %v1074_v0  ;;  %853 = vmatpush3.bf16.msra.mxu0 %v1181_v11 }
  0x32   :  { %854 = vmatprep.subr.bf16.mxu0 %v1074_v0 }
  0x33   :  { %839 = vmatmul.mubr.bf16.vlgmr.msra.gmra.mrb[0].mxu1 %v1076_v14  ;;  %v1026_v14 = vld [vmem:[#allocation3 + $0x18] sm:$0xff]  }
  0x34   :  { %863 = vmatpush3.bf16.msra.mxu1 %v1130_v1  ;;  %878 = vmatprep.mubr.msk.bf16.mxu1 %vm1075_vm0, %v1074_v0 }
  0x35   :  { %864 = vmatprep.subr.bf16.mxu1 %v1074_v0  ;;  %855 = vmatpush3.bf16.msra.mxu0 %v1190_v12 }
  0x36   :  { %856 = vmatprep.subr.bf16.mxu0 %v1074_v0 }
  0x38   :  { %865 = vmatpush3.bf16.msra.mxu1 %v1136_v2 }
  0x39   :  { %866 = vmatprep.subr.bf16.mxu1 %v1074_v0  ;;  %857 = vmatpush3.bf16.msra.mxu0 %v1199_v13 }
  0x3a   :  { %882 = vmatprep.subr.bf16.mxu0 %v1074_v0 }
  0x3c   :  { %867 = vmatpush3.bf16.msra.mxu1 %v1146_v4 }
  0x3d   :  { %868 = vmatprep.subr.bf16.mxu1 %v1074_v0 }
  0x40   :  { %869 = vmatpush3.bf16.msra.mxu1 %v1159_v8 }
  0x41   :  { %870 = vmatprep.subr.bf16.mxu1 %v1074_v0 }
  0x44   :  { %871 = vmatpush3.bf16.msra.mxu1 %v1169_v10 }
  0x45   :  { %872 = vmatprep.subr.bf16.mxu1 %v1074_v0 }
  0x48   :  { %873 = vmatpush3.bf16.msra.mxu1 %v1181_v11 }
  0x49   :  { %874 = vmatprep.subr.bf16.mxu1 %v1074_v0 }
  0x4c   :  { %875 = vmatpush3.bf16.msra.mxu1 %v1190_v12 }
  0x4d   :  { %876 = vmatprep.subr.bf16.mxu1 %v1074_v0 }
  0x50   :  { %877 = vmatpush3.bf16.msra.mxu1 %v1199_v13 }
  0x51   :  { %902 = vmatprep.subr.bf16.mxu1 %v1074_v0 }
  0xef   :  { %v1242_v17 = vpop.f32.mrb[0].mxu0 }
  0xf0   :  { %v139_v18 = vpop.f32.mrb[1].mxu0  ;;  %v148_v42 = vadd.f32 %v1242_v17, %v1249_v21 }
  0xf1   :  { %v1244_v19 = vpop.f32.mrb[2].mxu0  ;;  %v140_v22 = vadd.f32 %v1249_v21, %v139_v18 }
  0xf2   :  { %v142_v20 = vpop.f32.mrb[3].mxu0  ;;  %v151_v50 = vadd.f32 %v1244_v19, %v1249_v21 }
  0xf3   :  { %v143_v34 = vadd.f32 %v1249_v21, %v142_v20 }
  0xf7   :  { %v1270_v30 = vpop.f32.mrb[4].mxu0 }
  0xf8   :  { %v1272_v31 = vpop.f32.mrb[5].mxu0  ;;  %v164_v15 = vadd.f32 %v1270_v30, %v1249_v21 }
  0xf9   :  { %v1274_v32 = vpop.f32.mrb[6].mxu0  ;;  %v156_v58 = vadd.f32 %v1249_v21, %v1272_v31 }
  0xfa   :  { %v1276_v33 = vpop.f32.mrb[7].mxu0 }
 0x106   :  { %v268_v23 = vpop.f32.mrb[0].mxu1 }
 0x107   :  { %v274_v24 = vadd.f32 %v268_v23, %v140_v22  ;;  %v840_v25 = vpop.f32.mrb[1].mxu1 }
 0x108   :  { %v271_v26 = vpop.f32.mrb[2].mxu1  ;;  %v1028_v25 = vld [vmem:[#allocation3 + $0x28] sm:$0xff]  }
 0x109   :  { %1031 = vtanh.f32 %v274_v24  ;;  %v841_v27 = vpop.f32.mrb[3].mxu1  ;;  %v1027_v24 = vld [vmem:[#allocation3 + $0x20] sm:$0xff]   ;;  %v1029_v26 = vld [vmem:[#allocation3 + $0x30] sm:$0xff]  }
 0x10a   :  { %v1030_v27 = vld [vmem:[#allocation3 + $0x38] sm:$0xff]  }
 0x113   :  { %v1032_v28 = vpop.eup %1031 }
 0x114   :  { %v276_v29 = vpack.c.bf16 %v1032_v28, %v1032_v28  ;;  %v167_v28 = vadd.f32 %v1274_v32, %v1249_v21 }
 0x116   :  { %859 = vmatmul.mubr.bf16.vlgmr.msra.gmra.mrb[8].mxu0 %v276_v29 }
 0x117   :  { %883 = vmatpush3.bf16.msra.mxu0 %v1130_v1  ;;  %898 = vmatprep.mubr.msk.bf16.mxu0 %vm1075_vm0, %v1074_v0 }
 0x118   :  { %884 = vmatprep.subr.bf16.mxu0 %v1074_v0 }
 0x11b   :  { %885 = vmatpush3.bf16.msra.mxu0 %v1136_v2 }
 0x11c   :  { %886 = vmatprep.subr.bf16.mxu0 %v1074_v0 }
 0x11f   :  { %887 = vmatpush3.bf16.msra.mxu0 %v1146_v4 }
 0x120   :  { %888 = vmatprep.subr.bf16.mxu0 %v1074_v0 }
 0x123   :  { %889 = vmatpush3.bf16.msra.mxu0 %v1159_v8 }
 0x124   :  { %890 = vmatprep.subr.bf16.mxu0 %v1074_v0 }
 0x127   :  { %891 = vmatpush3.bf16.msra.mxu0 %v1169_v10 }
 0x128   :  { %892 = vmatprep.subr.bf16.mxu0 %v1074_v0 }
 0x12b   :  { %893 = vmatpush3.bf16.msra.mxu0 %v1181_v11 }
 0x12c   :  { %894 = vmatprep.subr.bf16.mxu0 %v1074_v0 }
 0x12f   :  { %895 = vmatpush3.bf16.msra.mxu0 %v1190_v12 }
 0x130   :  { %896 = vmatprep.subr.bf16.mxu0 %v1074_v0 }
 0x133   :  { %897 = vmatpush3.bf16.msra.mxu0 %v1199_v13 }
 0x134   :  { %922 = vmatprep.subr.bf16.mxu0 %v1074_v0 }
 0x1e9   :  { %v311_v35 = vpop.f32.mrb[8].mxu0 }
 0x1ea   :  { %v317_v36 = vadd.f32 %v311_v35, %v143_v34  ;;  %v860_v37 = vpop.f32.mrb[9].mxu0 }
 0x1eb   :  { %v314_v38 = vpop.f32.mrb[10].mxu0  ;;  %v714_v37 = vld [vmem:[%s1382_s5] ss:$0 sm:$0xff] }
 0x1ec   :  { %1033 = vtanh.f32 %v317_v36  ;;  %v861_v39 = vpop.f32.mrb[11].mxu0 }
 0x1f6   :  { %v1034_v40 = vpop.eup %1033 }
 0x1f7   :  { %v319_v41 = vpack.c.bf16 %v1034_v40, %v1034_v40 }
 0x1f9   :  { %879 = vmatmul.mubr.bf16.vlgmr.msra.gmra.mrb[4].mxu1 %v319_v41 }
 0x1fa   :  { %903 = vmatpush3.bf16.msra.mxu1 %v1130_v1  ;;  %918 = vmatprep.mubr.msk.bf16.mxu1 %vm1075_vm0, %v1074_v0 }
 0x1fb   :  { %904 = vmatprep.subr.bf16.mxu1 %v1074_v0 }
 0x1fe   :  { %905 = vmatpush3.bf16.msra.mxu1 %v1136_v2 }
 0x1ff   :  { %906 = vmatprep.subr.bf16.mxu1 %v1074_v0 }
 0x202   :  { %907 = vmatpush3.bf16.msra.mxu1 %v1146_v4 }
 0x203   :  { %908 = vmatprep.subr.bf16.mxu1 %v1074_v0 }
 0x206   :  { %909 = vmatpush3.bf16.msra.mxu1 %v1159_v8 }
 0x207   :  { %910 = vmatprep.subr.bf16.mxu1 %v1074_v0 }
 0x20a   :  { %911 = vmatpush3.bf16.msra.mxu1 %v1169_v10 }
 0x20b   :  { %912 = vmatprep.subr.bf16.mxu1 %v1074_v0 }
 0x20e   :  { %913 = vmatpush3.bf16.msra.mxu1 %v1181_v11 }
 0x20f   :  { %914 = vmatprep.subr.bf16.mxu1 %v1074_v0 }
 0x212   :  { %915 = vmatpush3.bf16.msra.mxu1 %v1190_v12 }
 0x213   :  { %916 = vmatprep.subr.bf16.mxu1 %v1074_v0 }
 0x216   :  { %917 = vmatpush3.bf16.msra.mxu1 %v1199_v13 }
 0x217   :  { %942 = vmatprep.subr.bf16.mxu1 %v1074_v0 }
 0x2cc   :  { %v354_v43 = vpop.f32.mrb[4].mxu1 }
 0x2cd   :  { %v360_v44 = vadd.f32 %v354_v43, %v148_v42  ;;  %v880_v45 = vpop.f32.mrb[5].mxu1 }
 0x2ce   :  { %v357_v46 = vpop.f32.mrb[6].mxu1 }
 0x2cf   :  { %1035 = vtanh.f32 %v360_v44  ;;  %v881_v47 = vpop.f32.mrb[7].mxu1 }
 0x2d9   :  { %v1036_v48 = vpop.eup %1035 }
 0x2da   :  { %v362_v49 = vpack.c.bf16 %v1036_v48, %v1036_v48 }
 0x2dc   :  { %899 = vmatmul.mubr.bf16.vlgmr.msra.gmra.mrb[12].mxu0 %v362_v49 }
 0x2dd   :  { %923 = vmatpush3.bf16.msra.mxu0 %v1130_v1  ;;  %938 = vmatprep.mubr.msk.bf16.mxu0 %vm1075_vm0, %v1074_v0 }
 0x2de   :  { %924 = vmatprep.subr.bf16.mxu0 %v1074_v0 }
 0x2e1   :  { %925 = vmatpush3.bf16.msra.mxu0 %v1136_v2 }
 0x2e2   :  { %926 = vmatprep.subr.bf16.mxu0 %v1074_v0 }
 0x2e5   :  { %927 = vmatpush3.bf16.msra.mxu0 %v1146_v4 }
 0x2e6   :  { %928 = vmatprep.subr.bf16.mxu0 %v1074_v0 }
 0x2e9   :  { %929 = vmatpush3.bf16.msra.mxu0 %v1159_v8 }
 0x2ea   :  { %930 = vmatprep.subr.bf16.mxu0 %v1074_v0 }
 0x2ed   :  { %931 = vmatpush3.bf16.msra.mxu0 %v1169_v10 }
 0x2ee   :  { %932 = vmatprep.subr.bf16.mxu0 %v1074_v0 }
 0x2f1   :  { %933 = vmatpush3.bf16.msra.mxu0 %v1181_v11 }
 0x2f2   :  { %934 = vmatprep.subr.bf16.mxu0 %v1074_v0 }
 0x2f5   :  { %935 = vmatpush3.bf16.msra.mxu0 %v1190_v12 }
 0x2f6   :  { %936 = vmatprep.subr.bf16.mxu0 %v1074_v0 }
 0x2f9   :  { %937 = vmatpush3.bf16.msra.mxu0 %v1199_v13 }
 0x2fa   :  { %962 = vmatprep.subr.bf16.mxu0 %v1074_v0 }
 0x3af   :  { %v397_v51 = vpop.f32.mrb[12].mxu0 }
 0x3b0   :  { %v403_v52 = vadd.f32 %v397_v51, %v151_v50  ;;  %v900_v53 = vpop.f32.mrb[13].mxu0 }
 0x3b1   :  { %v400_v54 = vpop.f32.mrb[14].mxu0 }
 0x3b2   :  { %1037 = vtanh.f32 %v403_v52  ;;  %v901_v55 = vpop.f32.mrb[15].mxu0 }
 0x3bc   :  { %v1038_v56 = vpop.eup %1037 }
 0x3bd   :  { %v405_v57 = vpack.c.bf16 %v1038_v56, %v1038_v56 }
 0x3bf   :  { %919 = vmatmul.mubr.bf16.vlgmr.msra.gmra.mrb[8].mxu1 %v405_v57 }
 0x3c0   :  { %943 = vmatpush3.bf16.msra.mxu1 %v1130_v1  ;;  %958 = vmatprep.mubr.msk.bf16.mxu1 %vm1075_vm0, %v1074_v0 }
 0x3c1   :  { %944 = vmatprep.subr.bf16.mxu1 %v1074_v0 }
 0x3c4   :  { %945 = vmatpush3.bf16.msra.mxu1 %v1136_v2 }
 0x3c5   :  { %946 = vmatprep.subr.bf16.mxu1 %v1074_v0 }
 0x3c8   :  { %947 = vmatpush3.bf16.msra.mxu1 %v1146_v4 }
 0x3c9   :  { %948 = vmatprep.subr.bf16.mxu1 %v1074_v0 }
 0x3cc   :  { %949 = vmatpush3.bf16.msra.mxu1 %v1159_v8 }
 0x3cd   :  { %950 = vmatprep.subr.bf16.mxu1 %v1074_v0 }
 0x3d0   :  { %951 = vmatpush3.bf16.msra.mxu1 %v1169_v10 }
 0x3d1   :  { %952 = vmatprep.subr.bf16.mxu1 %v1074_v0 }
 0x3d4   :  { %953 = vmatpush3.bf16.msra.mxu1 %v1181_v11 }
 0x3d5   :  { %954 = vmatprep.subr.bf16.mxu1 %v1074_v0 }
 0x3d8   :  { %955 = vmatpush3.bf16.msra.mxu1 %v1190_v12 }
 0x3d9   :  { %956 = vmatprep.subr.bf16.mxu1 %v1074_v0 }
 0x3dc   :  { %957 = vmatpush3.bf16.msra.mxu1 %v1199_v13 }
 0x3dd   :  { %982 = vmatprep.subr.bf16.mxu1 %v1074_v0 }
 0x492   :  { %v440_v59 = vpop.f32.mrb[8].mxu1 }
 0x493   :  { %v446_v60 = vadd.f32 %v440_v59, %v156_v58  ;;  %v920_v61 = vpop.f32.mrb[9].mxu1 }
 0x494   :  { %v443_v62 = vpop.f32.mrb[10].mxu1 }
 0x495   :  { %1039 = vtanh.f32 %v446_v60  ;;  %v921_v63 = vpop.f32.mrb[11].mxu1 }
 0x49f   :  { %v1040_v3 = vpop.eup %1039 }
 0x4a0   :  { %v448_v5 = vpack.c.bf16 %v1040_v3, %v1040_v3 }
 0x4a2   :  { %939 = vmatmul.mubr.bf16.vlgmr.msra.gmra.mrb[16].mxu0 %v448_v5 }
 0x4a3   :  { %963 = vmatpush3.bf16.msra.mxu0 %v1130_v1  ;;  %978 = vmatprep.mubr.msk.bf16.mxu0 %vm1075_vm0, %v1074_v0  ;;  %v159_v1 = vadd.f32 %v1249_v21, %v1276_v33 }
 0x4a4   :  { %964 = vmatprep.subr.bf16.mxu0 %v1074_v0 }
 0x4a7   :  { %965 = vmatpush3.bf16.msra.mxu0 %v1136_v2 }
 0x4a8   :  { %966 = vmatprep.subr.bf16.mxu0 %v1074_v0 }
 0x4ab   :  { %967 = vmatpush3.bf16.msra.mxu0 %v1146_v4 }
 0x4ac   :  { %968 = vmatprep.subr.bf16.mxu0 %v1074_v0 }
 0x4af   :  { %969 = vmatpush3.bf16.msra.mxu0 %v1159_v8 }
 0x4b0   :  { %970 = vmatprep.subr.bf16.mxu0 %v1074_v0 }
 0x4b3   :  { %971 = vmatpush3.bf16.msra.mxu0 %v1169_v10 }
 0x4b4   :  { %972 = vmatprep.subr.bf16.mxu0 %v1074_v0 }
 0x4b7   :  { %973 = vmatpush3.bf16.msra.mxu0 %v1181_v11  ;;  %v1023_v11 = vld [vmem:[#allocation3] sm:$0xff]  }
 0x4b8   :  { %974 = vmatprep.subr.bf16.mxu0 %v1074_v0 }
 0x4bb   :  { %975 = vmatpush3.bf16.msra.mxu0 %v1190_v12  ;;  %v1024_v12 = vld [vmem:[#allocation3 + $0x8] sm:$0xff]  }
 0x4bc   :  { %976 = vmatprep.subr.bf16.mxu0 %v1074_v0 }
 0x4bf   :  { %977 = vmatpush3.bf16.msra.mxu0 %v1199_v13  ;;  %v1025_v13 = vld [vmem:[#allocation3 + $0x10] sm:$0xff]  }
 0x575   :  { %v483_v2 = vpop.f32.mrb[16].mxu0 }
 0x576   :  { %v489_v4 = vadd.f32 %v483_v2, %v159_v1  ;;  %v940_v6 = vpop.f32.mrb[17].mxu0 }
 0x577   :  { %v486_v7 = vpop.f32.mrb[18].mxu0 }
 0x578   :  { %1041 = vtanh.f32 %v489_v4  ;;  %v941_v8 = vpop.f32.mrb[19].mxu0 }
 0x582   :  { %v1042_v9 = vpop.eup %1041 }
 0x583   :  { %v491_v10 = vpack.c.bf16 %v1042_v9, %v1042_v9 }
 0x585   :  { %959 = vmatmul.mubr.bf16.vlgmr.msra.gmra.mrb[12].mxu1 %v491_v10 }
 0x586   :  { %998 = vmatprep.mubr.msk.bf16.mxu1 %vm1075_vm0, %v1074_v0  ;;  %983 = vmatpush3.bf16.msra.mxu1 %v1023_v11 }
 0x587   :  { %984 = vmatprep.subr.bf16.mxu1 %v1074_v0 }
 0x58a   :  { %985 = vmatpush3.bf16.msra.mxu1 %v1024_v12 }
 0x58b   :  { %986 = vmatprep.subr.bf16.mxu1 %v1074_v0 }
 0x58e   :  { %987 = vmatpush3.bf16.msra.mxu1 %v1025_v13 }
 0x58f   :  { %988 = vmatprep.subr.bf16.mxu1 %v1074_v0 }
 0x592   :  { %989 = vmatpush3.bf16.msra.mxu1 %v1026_v14 }
 0x593   :  { %990 = vmatprep.subr.bf16.mxu1 %v1074_v0 }
 0x596   :  { %991 = vmatpush3.bf16.msra.mxu1 %v1027_v24 }
 0x597   :  { %992 = vmatprep.subr.bf16.mxu1 %v1074_v0 }
 0x59a   :  { %993 = vmatpush3.bf16.msra.mxu1 %v1028_v25 }
 0x59b   :  { %994 = vmatprep.subr.bf16.mxu1 %v1074_v0 }
 0x59e   :  { %995 = vmatpush3.bf16.msra.mxu1 %v1029_v26 }
 0x59f   :  { %996 = vmatprep.subr.bf16.mxu1 %v1074_v0 }
 0x5a2   :  { %997 = vmatpush3.bf16.msra.mxu1 %v1030_v27 }
 0x658   :  { %v526_v16 = vpop.f32.mrb[12].mxu1 }
 0x659   :  { %v532_v17 = vadd.f32 %v526_v16, %v164_v15  ;;  %v960_v18 = vpop.f32.mrb[13].mxu1 }
 0x65a   :  { %v529_v19 = vpop.f32.mrb[14].mxu1 }
 0x65b   :  { %1043 = vtanh.f32 %v532_v17  ;;  %v961_v20 = vpop.f32.mrb[15].mxu1 }
 0x665   :  { %v1044_v22 = vpop.eup %1043 }
 0x666   :  { %v534_v23 = vpack.c.bf16 %v1044_v22, %v1044_v22 }
 0x668   :  { %979 = vmatmul.mubr.bf16.vlgmr.msra.gmra.mrb[20].mxu0 %v534_v23 }
 0x73b   :  { %v569_v29 = vpop.f32.mrb[20].mxu0 }
 0x73c   :  { %v575_v30 = vadd.f32 %v569_v29, %v167_v28  ;;  %v980_v31 = vpop.f32.mrb[21].mxu0 }
 0x73d   :  { %v572_v33 = vpop.f32.mrb[22].mxu0 }
 0x73e   :  { %1045 = vtanh.f32 %v575_v30  ;;  %v981_v34 = vpop.f32.mrb[23].mxu0 }
 0x748   :  { %v1046_v35 = vpop.eup %1045 }
 0x749   :  { %v577_v36 = vpack.c.bf16 %v1046_v35, %v1046_v35 }
 0x74b   :  { %999 = vmatmul.mubr.bf16.vlgmr.msra.gmra.mrb[16].mxu1 %v577_v36 }
 0x81e   :  { %v683_v38 = vpop.f32.mrb[16].mxu1 }
 0x81f   :  { %v684_v0 = vadd.f32 %v714_v37, %v683_v38  ;;  %v1000_v39 = vpop.f32.mrb[17].mxu1 }
 0x820   :  { %v686_v40 = vpop.f32.mrb[18].mxu1 }
 0x821   :  { %689 = vst [vmem:[%s1383_s6] sm:$0xff] %v684_v0  ;;  %v1001_v21 = vpop.f32.mrb[19].mxu1 }
 0x822   :  { %694 = vsyncpa [#allocation4], 1 }

</bundles_post_ra>
